<compile_context>
chip_gen: v7x
topology: tpu7x:2x2x1
jax: 0.10.0
libtpu: 0.0.40
codegen_flags: <defaults>
</compile_context>

<pallas_src>
import functools

import jax
import jax.numpy as jnp
from jax.experimental import pallas as pl
from jax.experimental.pallas import tpu as pltpu


def _round_up(v, m):
    return (v + m - 1) // m * m


# -----------------------------------------------------------------------------
# Phase A: streamed reduction over row tiles -> per-channel mean -> excitation.
# -----------------------------------------------------------------------------
def _reduce_excite_kernel(x_ref, w1t_ref, w2t_ref, scale_ref, acc_ref, *, inv_n):
    # x_ref:     (TILE_N, C_pad)   one row tile of x (zero rows beyond the real N)
    # w1t_ref:   (C_pad, CR_pad)   fc1.weight.T, zero-padded
    # w2t_ref:   (CR_pad, C_pad)   fc2.weight.T, zero-padded
    # scale_ref: (1, C_pad)        output: sigmoid scale, written once on last step
    # acc_ref:   (1, C_pad) f32    running per-channel sum (persists across grid)
    i = pl.program_id(0)

    @pl.when(i == 0)
    def _():
        acc_ref[...] = jnp.zeros_like(acc_ref)

    # Partial per-channel sum for this tile (padded rows are zero, so harmless).
    x = x_ref[...].astype(jnp.float32)
    acc_ref[...] += jnp.sum(x, axis=0, keepdims=True)

    # Excitation runs exactly once (kept out of the per-tile hot path).
    @pl.when(i == pl.num_programs(0) - 1)
    def _():
        se = acc_ref[...] * inv_n                       # (1, C_pad) mean over real rows
        # Replicate to 8 sublanes so the tiny matmuls use a full MXU tile height.
        se8 = jnp.broadcast_to(se, (8, se.shape[1]))
        h = jnp.dot(se8, w1t_ref[...], preferred_element_type=jnp.float32)
        h = jnp.maximum(h, 0.0)
        s = jnp.dot(h, w2t_ref[...], preferred_element_type=jnp.float32)
        s = jax.nn.sigmoid(s)
        scale_ref[...] = s[0:1, :]                      # all 8 rows identical


# -----------------------------------------------------------------------------
# Phase B: streamed, pipelined scale pass (HBM-bandwidth bound hot loop).
# -----------------------------------------------------------------------------
def _scale_kernel(x_ref, scale_ref, o_ref):
    # out = x * scale, scale (1, C_pad) broadcast over the row tile.
    o_ref[...] = (x_ref[...].astype(jnp.float32) * scale_ref[...]).astype(o_ref.dtype)


def se_block(x, w1, w2):
    """SEBlock forward. x: (N, C); w1: (C//r, C) = fc1.weight; w2: (C, C//r) = fc2.weight."""
    n, c = x.shape
    cr = w1.shape[0]
    itemsize = x.dtype.itemsize

    # Glue: pre-transpose weights so the kernel matmuls are plain row-major.
    w1t = w1.T.astype(jnp.float32)          # (C, C//r)
    w2t = w2.T.astype(jnp.float32)          # (C//r, C)

    # Lane-dense padding: channels and hidden dim -> multiples of 128 (zero padding,
    # so padded channels/hidden units contribute nothing and are sliced off at the end).
    c_pad = _round_up(c, 128)
    cr_pad = _round_up(cr, 128)

    # Row tile: biggest tile (multiple of 8, <= 512 rows, <= ~4 MiB) so the
    # double-buffered in+out working set stays well inside the 32 MiB default
    # scoped VMEM (the binding constraint on v7x's 64 MiB physical VMEM).
    bytes_per_row = c_pad * itemsize
    tile_cap = max(8, min(512, (4 << 20) // bytes_per_row // 8 * 8))
    tile_n = min(tile_cap, _round_up(n, 8))
    n_pad = _round_up(n, tile_n)
    num_tiles = n_pad // tile_n

    x_pad = jnp.pad(x, ((0, n_pad - n), (0, c_pad - c)))
    w1t_pad = jnp.pad(w1t, ((0, c_pad - c), (0, cr_pad - cr)))
    w2t_pad = jnp.pad(w2t, ((0, cr_pad - cr), (0, c_pad - c)))

    # ---- Phase A: per-channel mean + excitation (reduction axis -> "arbitrary") ----
    scale = pl.pallas_call(
        functools.partial(_reduce_excite_kernel, inv_n=1.0 / n),
        out_shape=jax.ShapeDtypeStruct((1, c_pad), jnp.float32),
        grid_spec=pltpu.PrefetchScalarGridSpec(
            num_scalar_prefetch=0,
            grid=(num_tiles,),
            in_specs=[
                pl.BlockSpec((tile_n, c_pad), lambda i: (i, 0)),
                pl.BlockSpec((c_pad, cr_pad), lambda i: (0, 0)),
                pl.BlockSpec((cr_pad, c_pad), lambda i: (0, 0)),
            ],
            out_specs=pl.BlockSpec((1, c_pad), lambda i: (0, 0)),
            scratch_shapes=[pltpu.VMEM((1, c_pad), jnp.float32)],
        ),
        compiler_params=pltpu.CompilerParams(
            dimension_semantics=("arbitrary",)),
        cost_estimate=pl.CostEstimate(
            flops=n_pad * c_pad + 2 * 8 * c_pad * cr_pad,
            transcendentals=8 * c_pad,
            bytes_accessed=n_pad * c_pad * itemsize
                           + 2 * c_pad * cr_pad * 4 + c_pad * 4,
        ),
    )(x_pad, w1t_pad, w2t_pad)

    # ---- Phase B: scale pass; "parallel" row axis shards across v7x's 2 TCs ----
    out_pad = pl.pallas_call(
        _scale_kernel,
        out_shape=jax.ShapeDtypeStruct((n_pad, c_pad), x.dtype),
        grid_spec=pltpu.PrefetchScalarGridSpec(
            num_scalar_prefetch=0,
            grid=(num_tiles,),
            in_specs=[
                pl.BlockSpec((tile_n, c_pad), lambda i: (i, 0)),
                pl.BlockSpec((1, c_pad), lambda i: (0, 0)),
            ],
            out_specs=pl.BlockSpec((tile_n, c_pad), lambda i: (i, 0)),
        ),
        compiler_params=pltpu.CompilerParams(
            dimension_semantics=("parallel",)),
        cost_estimate=pl.CostEstimate(
            flops=n_pad * c_pad,
            transcendentals=0,
            bytes_accessed=2 * n_pad * c_pad * itemsize + c_pad * 4,
        ),
    )(x_pad, scale)

    return out_pad[:n, :c]


def _reference(x, w1, w2):
    # Pure-JAX reference matching the PyTorch forward.
    se = jnp.mean(x, axis=0, keepdims=True)
    se = jax.nn.relu(se @ w1.T)
    se = jax.nn.sigmoid(se @ w2.T)
    return x * se


if __name__ == "__main__":
    key = jax.random.PRNGKey(0)
    k_x, k_w1, k_w2 = jax.random.split(key, 3)

    N, C, R = 8, 32, 4          # batch rows, channels, reduction
    CR = C // R

    x = jax.random.normal(k_x, (N, C), dtype=jnp.float32)
    # deterministic "Kaiming-ish" init (synthetic weights, no checkpoint load)
    w1 = jax.random.uniform(k_w1, (CR, C), dtype=jnp.float32,
                            minval=-1.0, maxval=1.0) * (1.0 / jnp.sqrt(C * 1.0))
    w2 = jax.random.uniform(k_w2, (C, CR), dtype=jnp.float32,
                            minval=-1.0, maxval=1.0) * (1.0 / jnp.sqrt(CR * 1.0))

    out = se_block(x, w1, w2)
    out = jax.block_until_ready(out)

    ref = _reference(x, w1, w2)
    assert jnp.allclose(out, ref, atol=1e-5, rtol=1e-5), "mismatch vs reference"

    print("KERNEL_OK")
</pallas_src>

<mosaic_0001>
module attributes {stable_mosaic.version = 11 : i64} {
  func.func @_reduce_excite_kernel(%arg0: i32, %arg1: memref<8x128xf32, #tpu.memory_space<vmem>>, %arg2: memref<128x128xf32, #tpu.memory_space<vmem>>, %arg3: memref<128x128xf32, #tpu.memory_space<vmem>>, %arg4: memref<1x128xf32, #tpu.memory_space<vmem>>, %arg5: memref<1x128xf32, #tpu.memory_space<vmem>>) attributes {dimension_semantics = [#tpu.dimension_semantics<arbitrary>], iteration_bounds = array<i64: 1>, scalar_prefetch = 0 : i64, scratch_operands = 1 : i64, tpu.core_type = #tpu.core_type<tc>, window_params = [{transform_indices = @transform_0, window_bounds = array<i64: 8, 128>}, {pipeline_mode = #tpu.pipeline_mode<synchronous>, transform_indices = @transform_1, window_bounds = array<i64: 128, 128>}, {pipeline_mode = #tpu.pipeline_mode<synchronous>, transform_indices = @transform_2, window_bounds = array<i64: 128, 128>}, {pipeline_mode = #tpu.pipeline_mode<synchronous>, transform_indices = @transform_3, window_bounds = array<i64: 1, 128>}]} {
    %c0_i32 = arith.constant 0 : i32
    %0 = arith.cmpi eq, %arg0, %c0_i32 : i32
    %1 = arith.extui %0 : i1 to i32
    %c0_i32_0 = arith.constant 0 : i32
    %2 = arith.cmpi ne, %1, %c0_i32_0 : i32
    scf.if %2 {
      %cst_8 = arith.constant 0.000000e+00 : f32
      %12 = vector.broadcast %cst_8 : f32 to vector<1x128xf32>
      %c0_9 = arith.constant 0 : index
      %c0_10 = arith.constant 0 : index
      %13 = vector.load %arg5[%c0_9, %c0_10] : memref<1x128xf32, #tpu.memory_space<vmem>>, vector<1x128xf32>
      tpu.vector_store %arg5[%c0_9, %c0_10], %12 {strides = array<i32>} : memref<1x128xf32, #tpu.memory_space<vmem>>, vector<1x128xf32>,
    } else {
    }
    %c0 = arith.constant 0 : index
    %c0_1 = arith.constant 0 : index
    %3 = vector.load %arg1[%c0, %c0_1] : memref<8x128xf32, #tpu.memory_space<vmem>>, vector<8x128xf32>
    %c0_2 = arith.constant 0 : index
    %c0_3 = arith.constant 0 : index
    %4 = vector.load %arg5[%c0_2, %c0_3] : memref<1x128xf32, #tpu.memory_space<vmem>>, vector<1x128xf32>
    %cst = arith.constant dense<0.000000e+00> : vector<128xf32>
    %5 = vector.multi_reduction <add>, %3, %cst [0] : vector<8x128xf32> to vector<128xf32>
    %6 = vector.shape_cast %5 : vector<128xf32> to vector<1x128xf32>
    %7 = arith.addf %4, %6 : vector<1x128xf32>
    %c0_4 = arith.constant 0 : index
    %c0_5 = arith.constant 0 : index
    %8 = vector.load %arg5[%c0_4, %c0_5] : memref<1x128xf32, #tpu.memory_space<vmem>>, vector<1x128xf32>
    tpu.vector_store %arg5[%c0_4, %c0_5], %7 {strides = array<i32>} : memref<1x128xf32, #tpu.memory_space<vmem>>, vector<1x128xf32>,
    %c0_i32_6 = arith.constant 0 : i32
    %9 = arith.cmpi eq, %arg0, %c0_i32_6 : i32
    %10 = arith.extui %9 : i1 to i32
    %c0_i32_7 = arith.constant 0 : i32
    %11 = arith.cmpi ne, %10, %c0_i32_7 : i32
    scf.if %11 {
      %c0_8 = arith.constant 0 : index
      %c0_9 = arith.constant 0 : index
      %12 = vector.load %arg5[%c0_8, %c0_9] : memref<1x128xf32, #tpu.memory_space<vmem>>, vector<1x128xf32>
      %cst_10 = arith.constant 1.250000e-01 : f32
      %13 = vector.broadcast %cst_10 : f32 to vector<1x128xf32>
      %14 = arith.mulf %12, %13 : vector<1x128xf32>
      %15 = vector.shape_cast %14 : vector<1x128xf32> to vector<1x128xf32>
      %16 = vector.broadcast %15 : vector<1x128xf32> to vector<8x128xf32>
      %c0_11 = arith.constant 0 : index
      %c0_12 = arith.constant 0 : index
      %17 = vector.load %arg2[%c0_11, %c0_12] : memref<128x128xf32, #tpu.memory_space<vmem>>, vector<128x128xf32>
      %cst_13 = arith.constant dense<0.000000e+00> : vector<8x128xf32>
      %18 = tpu.matmul %16, %17, %cst_13 {dimension_numbers = #tpu.dot_dimension_numbers<[1], [0], [0], [1], [0, 0, 1, 1], [], []>} : vector<8x128xf32>, vector<128x128xf32>, vector<8x128xf32> -> vector<8x128xf32>
      %cst_14 = arith.constant 0.000000e+00 : f32
      %19 = vector.broadcast %cst_14 : f32 to vector<8x128xf32>
      %20 = arith.maximumf %18, %19 : vector<8x128xf32>
      %c0_15 = arith.constant 0 : index
      %c0_16 = arith.constant 0 : index
      %21 = vector.load %arg3[%c0_15, %c0_16] : memref<128x128xf32, #tpu.memory_space<vmem>>, vector<128x128xf32>
      %cst_17 = arith.constant dense<0.000000e+00> : vector<8x128xf32>
      %22 = tpu.matmul %20, %21, %cst_17 {dimension_numbers = #tpu.dot_dimension_numbers<[1], [0], [0], [1], [0, 0, 1, 1], [], []>} : vector<8x128xf32>, vector<128x128xf32>, vector<8x128xf32> -> vector<8x128xf32>
      %23 = arith.negf %22 : vector<8x128xf32>
      %24 = math.exp %23 : vector<8x128xf32>
      %cst_18 = arith.constant 1.000000e+00 : f32
      %25 = vector.broadcast %cst_18 : f32 to vector<8x128xf32>
      %26 = arith.addf %25, %24 : vector<8x128xf32>
      %27 = arith.divf %25, %26 : vector<8x128xf32>
      %28 = vector.extract_strided_slice %27 {offsets = [0, 0], sizes = [1, 128], strides = [1, 1]} : vector<8x128xf32> to vector<1x128xf32>
      %c0_19 = arith.constant 0 : index
      %c0_20 = arith.constant 0 : index
      %29 = vector.load %arg4[%c0_19, %c0_20] : memref<1x128xf32, #tpu.memory_space<vmem>>, vector<1x128xf32>
      tpu.vector_store %arg4[%c0_19, %c0_20], %28 {strides = array<i32>} : memref<1x128xf32, #tpu.memory_space<vmem>>, vector<1x128xf32>,
    } else {
    }
    return
  }
  func.func @transform_0(%arg0: i32) -> (i32, i32) {
    %c0_i32 = arith.constant 0 : i32
    %c0_i32_0 = arith.constant 0 : i32
    return %arg0, %c0_i32 : i32, i32
  }
  func.func @transform_1(%arg0: i32) -> (i32, i32) {
    %c0_i32 = arith.constant 0 : i32
    %c0_i32_0 = arith.constant 0 : i32
    %c0_i32_1 = arith.constant 0 : i32
    return %c0_i32, %c0_i32_0 : i32, i32
  }
  func.func @transform_2(%arg0: i32) -> (i32, i32) {
    %c0_i32 = arith.constant 0 : i32
    %c0_i32_0 = arith.constant 0 : i32
    %c0_i32_1 = arith.constant 0 : i32
    return %c0_i32, %c0_i32_0 : i32, i32
  }
  func.func @transform_3(%arg0: i32) -> (i32, i32) {
    %c0_i32 = arith.constant 0 : i32
    %c0_i32_0 = arith.constant 0 : i32
    %c0_i32_1 = arith.constant 0 : i32
    return %c0_i32, %c0_i32_0 : i32, i32
  }
}

</mosaic_0001>

<bundles_post_ra>
// kernel: tpu_custom_call.1
= control target key start
LH: loop header
LB: loop body
LE: loop exit
PB: predicated region body
PF: predicated region fallthrough
CT: control target
= control target key end

     0   :  { %8 = vsyncpa [#allocation4], 0  ;;  %s635_s0 = inlined_call_operand.hbm [shape: f32[8,128], index: 0, kind: input, shape index: {}]   ;;  %s636_s1 = inlined_call_operand.hbm [shape: f32[128,128], index: 1, kind: input, shape index: {}]   ;;  %s637_s2 = inlined_call_operand.hbm [shape: f32[128,128], index: 2, kind: input, shape index: {}]   ;;  %s638_s3 = inlined_call_operand.hbm [shape: f32[1,128], index: 3, kind: output, shape index: {}]  }
   0x1   :  { %9 = vsyncpa [#allocation7], 0 }
   0x2   :  { %10 = vsyncpa [#allocation5], 0  ;;  %s536_s12 = smov [#allocation6]   ;;  %s442_s16 = scalar_lea.hbm %s636_s1, 2048 }
   0x3   :  { %s26_s13 = sshll.u32 %s536_s12, 4  ;;  %p443_p0 = scmp.ne.s32.totalorder %s636_s1, %s442_s16  ;;  %s27_s13 = int_to_ptr.vmem [resolvable:$true] %s26_s13 }
   0x4   :  { %p446_p1 = scmp.lt.u32.totalorder %s442_s16, %s636_s1 }
   0x6   :  { %p448_p2 = pnand %p446_p1, %p443_p0 }
   0x8   :  { %451 = shalt.err (!%p448_p2)
}
   0x9   :  { %s452_s21 = scalar_lea.vmem %s27_s13, 2048  ;;  %p457_p4 = scmp.lt.s32.totalorder %s27_s13, %s27_s13 }
   0xa   :  { %p453_p3 = scmp.ne.s32.totalorder %s27_s13, %s452_s21  ;;  %p458_p5 = scmp.lt.s32.totalorder %s452_s21, %s452_s21 }
   0xc   :  { %p459_p6 = por %p458_p5, %p457_p4 }
   0xe   :  { %p460_p7 = pnand %p459_p6, %p453_p3 }
  0x10   :  { %463 = shalt.err (!%p460_p7)
}
  0x11   :  { %s537_s22 = smov 128   ;;  %s538_s23 = smov 8  }
  0x12   :  { %32 = dma.hbm_to_vmem [thread:$0]  %s636_s1, 2048, %s27_s13, [#allocation7], %s537_s22, %s537_s22, %s538_s23  }
  0x13   :  { %s539_s26 = smov [#allocation3]   ;;  %s540_s28 = smov [#allocation8]  }
  0x14   :  { %s17_s27 = sshll.u32 %s539_s26, 4  ;;  %s38_s29 = sshll.u32 %s540_s28, 4  ;;  %s18_s27 = int_to_ptr.vmem [resolvable:$true] %s17_s27  ;;  %s39_s29 = int_to_ptr.vmem [resolvable:$true] %s38_s29 }
  0x15   :  { %s464_s5 = scalar_lea.hbm %s635_s0, 128 }
  0x16   :  { %p465_p8 = scmp.ne.s32.totalorder %s635_s0, %s464_s5  ;;  %p468_p9 = scmp.lt.u32.totalorder %s464_s5, %s635_s0 }
  0x18   :  { %p470_p10 = pnand %p468_p9, %p465_p8 }
  0x1a   :  { %473 = shalt.err (!%p470_p10)
}
  0x1b   :  { %s474_s1 = scalar_lea.vmem %s18_s27, 128  ;;  %p479_p12 = scmp.lt.s32.totalorder %s18_s27, %s18_s27 }
  0x1c   :  { %p475_p11 = scmp.ne.s32.totalorder %s18_s27, %s474_s1  ;;  %p480_p13 = scmp.lt.s32.totalorder %s474_s1, %s474_s1 }
  0x1e   :  { %p481_p0 = por %p480_p13, %p479_p12 }
  0x20   :  { %p482_p1 = pnand %p481_p0, %p475_p11 }
  0x22   :  { %485 = shalt.err (!%p482_p1)
}
  0x23   :  { %20 = dma.hbm_to_vmem [thread:$0]  %s635_s0, 128, %s18_s27, [#allocation4]  }
  0x24   :  { %s486_s14 = scalar_lea.hbm %s637_s2, 2048 }
  0x25   :  { %p487_p2 = scmp.ne.s32.totalorder %s637_s2, %s486_s14  ;;  %p490_p3 = scmp.lt.u32.totalorder %s486_s14, %s637_s2 }
  0x27   :  { %p492_p4 = pnand %p490_p3, %p487_p2 }
  0x29   :  { %495 = shalt.err (!%p492_p4)
}
  0x2a   :  { %s496_s19 = scalar_lea.vmem %s39_s29, 2048  ;;  %p501_p6 = scmp.lt.s32.totalorder %s39_s29, %s39_s29 }
  0x2b   :  { %p497_p5 = scmp.ne.s32.totalorder %s39_s29, %s496_s19  ;;  %p502_p7 = scmp.lt.s32.totalorder %s496_s19, %s496_s19 }
  0x2d   :  { %p503_p8 = por %p502_p7, %p501_p6 }
  0x2f   :  { %p504_p9 = pnand %p503_p8, %p497_p5 }
  0x31   :  { %507 = shalt.err (!%p504_p9)
}
  0x32   :  { %44 = dma.hbm_to_vmem [thread:$0]  %s637_s2, 2048, %s39_s29, [#allocation7], %s537_s22, %s537_s22, %s538_s23  }
  0x33   :  { %530 = dma.done.wait [#allocation4], 128  }
  0x34   :  { %531 = vsyncadd [#allocation4], 4294967168 }
  0x35   :  { %532 = dma.done.wait [#allocation7], 4096  }
  0x36   :  { %533 = vsyncadd [#allocation7], 4294963200  ;;  %v541_v0 = vmov 0.0|0.0   ;;  %v542_v1 = vmov 0.0   ;;  %vm543_vm0 = vmmov 0   ;;  %v80_v2 = vld [vmem:[#allocation6] sm:$0xff]  ;;  %v75_v40 = vlaneseq }
  0x37   :  { %381 = vmatprep.subr.bf16.mxu0 %v541_v0  ;;  %58 = vst [vmem:[#allocation2] sm:$0x1] %v542_v1  ;;  %343 = vmatprep.mubr.msk.f32.mxu0 %vm543_vm0, %v542_v1  ;;  %v81_v3 = vld [vmem:[#allocation6 + $0x8] sm:$0xff]  ;;  %v82_v4 = vld [vmem:[#allocation6 + $0x10] sm:$0xff]  ;;  %v83_v6 = vld [vmem:[#allocation6 + $0x18] sm:$0xff]  ;;  %s544_s2 = smov [#allocation9]  }
  0x38   :  { %405 = vmatprep.subr.bf16.mxu1 %v541_v0  ;;  %378 = vmatprep.mubr.msk.f32.mxu1 %vm543_vm0, %v542_v1  ;;  %v382_v5 = vpack.c.bf16 %v81_v3, %v80_v2  ;;  %v385_v7 = vpack.c.bf16 %v83_v6, %v82_v4  ;;  %v84_v8 = vld [vmem:[#allocation6 + $0x20] sm:$0xff]  ;;  %v85_v9 = vld [vmem:[#allocation6 + $0x28] sm:$0xff]  ;;  %v59_v10 = vld [vmem:[#allocation3] sm:$0xff]  ;;  %v76_v47 = vshrl.u32 %v75_v40, 7  ;;  %s266_s21 = sshll.u32 %s544_s2, 4  ;;  %s267_s21 = int_to_ptr.vmem [resolvable:$true] %s266_s21 }
  0x39   :  { %v61_v11 = vrot.slane %v59_v10, 4  ;;  %v167_v12 = vld [vmem:[#allocation8] sm:$0xff]  ;;  %v168_v13 = vld [vmem:[#allocation8 + $0x8] sm:$0xff]  ;;  %v169_v14 = vld [vmem:[#allocation8 + $0x10] sm:$0xff]  ;;  %v388_v15 = vpack.c.bf16 %v85_v9, %v84_v8  ;;  %s508_s22 = scalar_lea.vmem %s267_s21, 16  ;;  %s512_s23 = scalar_lea.vmem %s267_s21, 32 }
  0x3a   :  { %383 = vmatpush3.bf16.msra.mxu0 %v382_v5  ;;  %v406_v16 = vpack.c.bf16 %v168_v13, %v167_v12  ;;  %v170_v17 = vld [vmem:[#allocation8 + $0x18] sm:$0xff]  ;;  %v86_v18 = vld [vmem:[#allocation6 + $0x30] sm:$0xff]  ;;  %v171_v23 = vld [vmem:[#allocation8 + $0x20] sm:$0xff]  ;;  %v77_v54 = vsub.s32 0, %v76_v47  ;;  %p509_p10 = scmp.ne.s32.totalorder %s267_s21, %s508_s22  ;;  %p513_p11 = scmp.lt.s32.totalorder %s267_s21, %s267_s21 }
  0x3b   :  { %384 = vmatprep.subr.bf16.mxu0 %v541_v0  ;;  %v87_v19 = vld [vmem:[#allocation6 + $0x38] sm:$0xff]  ;;  %v62_v20 = vadd.f32 %v61_v11, %v59_v10  ;;  %v409_v21 = vpack.c.bf16 %v170_v17, %v169_v14  ;;  %v172_v24 = vld [vmem:[#allocation8 + $0x28] sm:$0xff]  ;;  %v88_v26 = vld [vmem:[#allocation6 + $0x40] sm:$0xff]  ;;  %p514_p12 = scmp.lt.s32.totalorder %s512_s23, %s508_s22 }
  0x3c   :  { %407 = vmatpush3.bf16.msra.mxu1 %v406_v16  ;;  %v391_v25 = vpack.c.bf16 %v87_v19, %v86_v18  ;;  %v89_v27 = vld [vmem:[#allocation6 + $0x48] sm:$0xff]  ;;  %v412_v29 = vpack.c.bf16 %v172_v24, %v171_v23  ;;  %v173_v31 = vld [vmem:[#allocation8 + $0x30] sm:$0xff]  ;;  %v174_v32 = vld [vmem:[#allocation8 + $0x38] sm:$0xff] }
  0x3d   :  { %v63_v22 = vrot.slane %v62_v20, 2  ;;  %408 = vmatprep.subr.bf16.mxu1 %v541_v0  ;;  %v394_v33 = vpack.c.bf16 %v89_v27, %v88_v26  ;;  %v90_v35 = vld [vmem:[#allocation6 + $0x50] sm:$0xff]  ;;  %v91_v36 = vld [vmem:[#allocation6 + $0x58] sm:$0xff]  ;;  %v415_v38 = vpack.c.bf16 %v174_v32, %v173_v31  ;;  %v175_v41 = vld [vmem:[#allocation8 + $0x40] sm:$0xff]  ;;  %p515_p13 = por %p514_p12, %p513_p11 }
  0x3e   :  { %386 = vmatpush3.bf16.msra.mxu0 %v385_v7  ;;  %v60_v34 = vld [vmem:[#allocation2] sm:$0x1]  ;;  %v176_v42 = vld [vmem:[#allocation8 + $0x48] sm:$0xff]  ;;  %v397_v43 = vpack.c.bf16 %v91_v36, %v90_v35  ;;  %v92_v44 = vld [vmem:[#allocation6 + $0x60] sm:$0xff] }
  0x3f   :  { %387 = vmatprep.subr.bf16.mxu0 %v541_v0  ;;  %v64_v28 = vadd.f32 %v63_v22, %v62_v20  ;;  %v93_v45 = vld [vmem:[#allocation6 + $0x68] sm:$0xff]  ;;  %v418_v46 = vpack.c.bf16 %v176_v42, %v175_v41  ;;  %v177_v48 = vld [vmem:[#allocation8 + $0x50] sm:$0xff]  ;;  %v178_v49 = vld [vmem:[#allocation8 + $0x58] sm:$0xff]  ;;  %p516_p0 = pnand %p515_p13, %p509_p10 }
  0x40   :  { %410 = vmatpush3.bf16.msra.mxu1 %v409_v21  ;;  %v400_v50 = vpack.c.bf16 %v93_v45, %v92_v44  ;;  %v94_v51 = vld [vmem:[#allocation6 + $0x70] sm:$0xff]  ;;  %v95_v52 = vld [vmem:[#allocation6 + $0x78] sm:$0xff]  ;;  %v421_v53 = vpack.c.bf16 %v178_v49, %v177_v48  ;;  %v179_v55 = vld [vmem:[#allocation8 + $0x60] sm:$0xff] }
  0x41   :  { %v65_v30 = vrot.slane %v64_v28, 1  ;;  %411 = vmatprep.subr.bf16.mxu1 %v541_v0  ;;  %v180_v56 = vld [vmem:[#allocation8 + $0x68] sm:$0xff]  ;;  %v403_v57 = vpack.c.bf16 %v95_v52, %v94_v51  ;;  %v181_v62 = vld [vmem:[#allocation8 + $0x70] sm:$0xff]  ;;  %v182_v63 = vld [vmem:[#allocation8 + $0x78] sm:$0xff] }
  0x42   :  { %389 = vmatpush3.bf16.msra.mxu0 %v388_v15  ;;  %v424_v60 = vpack.c.bf16 %v180_v56, %v179_v55  ;;  %v427_v1 = vpack.c.bf16 %v182_v63, %v181_v62 }
  0x43   :  { %390 = vmatprep.subr.bf16.mxu0 %v541_v0  ;;  %v66_v37 = vadd.f32 %v65_v30, %v64_v28 }
  0x44   :  { %413 = vmatpush3.bf16.msra.mxu1 %v412_v29 }
  0x45   :  { %v67_v39 = vadd.f32 %v66_v37, %v60_v34  ;;  %414 = vmatprep.subr.bf16.mxu1 %v541_v0 }
  0x46   :  { %392 = vmatpush3.bf16.msra.mxu0 %v391_v25 }
  0x47   :  { %393 = vmatprep.subr.bf16.mxu0 %v541_v0  ;;  %68 = vst [vmem:[#allocation2] sm:$0x1] %v67_v39 }
  0x48   :  { %416 = vmatpush3.bf16.msra.mxu1 %v415_v38 }
  0x49   :  { %417 = vmatprep.subr.bf16.mxu1 %v541_v0 }
  0x4a   :  { %395 = vmatpush3.bf16.msra.mxu0 %v394_v33 }
  0x4b   :  { %396 = vmatprep.subr.bf16.mxu0 %v541_v0 }
  0x4c   :  { %419 = vmatpush3.bf16.msra.mxu1 %v418_v46 }
  0x4d   :  { %420 = vmatprep.subr.bf16.mxu1 %v541_v0 }
  0x4e   :  { %398 = vmatpush3.bf16.msra.mxu0 %v397_v43  ;;  %v72_v58 = vld [vmem:[#allocation2] sm:$0x1] }
  0x4f   :  { %399 = vmatprep.subr.bf16.mxu0 %v541_v0  ;;  %v73_v59 = vmul.f32 0.125, %v72_v58 }
  0x50   :  { %422 = vmatpush3.bf16.msra.mxu1 %v421_v53 }
  0x51   :  { %v78_v61 = vrot.slane %v73_v59, %v77_v54  ;;  %423 = vmatprep.subr.bf16.mxu1 %v541_v0 }
  0x52   :  { %401 = vmatpush3.bf16.msra.mxu0 %v400_v50 }
  0x53   :  { %402 = vmatprep.subr.bf16.mxu0 %v541_v0 }
  0x54   :  { %425 = vmatpush3.bf16.msra.mxu1 %v424_v60 }
  0x55   :  { %426 = vmatprep.subr.bf16.mxu1 %v541_v0 }
  0x56   :  { %404 = vmatpush3.bf16.msra.mxu0 %v403_v57 }
  0x58   :  { %428 = vmatpush3.bf16.msra.mxu1 %v427_v1 }
  0x59   :  { %344 = vmatmul.mubr.f32.vlgmr.msra.gmra.mrb[0].mxu0 %v78_v61 }
 0x12c   :  { %v162_v2 = vpop.f32.mrb[0].mxu0 }
 0x12d   :  { %v166_v3 = vmax.f32 %v162_v2, 0.0  ;;  %v345_v4 = vpop.f32.mrb[1].mxu0 }
 0x12f   :  { %379 = vmatmul.mubr.f32.vlgmr.msra.gmra.mrb[0].mxu1 %v166_v3 }
 0x202   :  { %v249_v5 = vpop.f32.mrb[0].mxu1 }
 0x203   :  { %v276_v6 = vmul.f32 -1.442695, %v249_v5  ;;  %v380_v7 = vpop.f32.mrb[1].mxu1 }
 0x205   :  { %438 = vpow2.f32 %v276_v6 }
 0x20f   :  { %v439_v8 = vpop.eup %438 }
 0x210   :  { %v256_v9 = vadd.f32 1.0, %v439_v8 }
 0x212   :  { %440 = vrcp.f32 %v256_v9 }
 0x21c   :  { %v441_v10 = vpop.eup %440 }
 0x21d   :  { %259 = vst [vmem:[#allocation9] sm:$0x1] %v441_v10 }
 0x21e   :  { %519 = shalt.err (!%p516_p0)
}
 0x21f   :  { %s520_s26 = scalar_lea.hbm %s638_s3, 16 }
 0x220   :  { %p521_p1 = scmp.ne.s32.totalorder %s638_s3, %s520_s26  ;;  %p524_p2 = scmp.lt.u32.totalorder %s520_s26, %s638_s3 }
 0x222   :  { %p526_p3 = pnand %p524_p2, %p521_p1 }
 0x224   :  { %529 = shalt.err (!%p526_p3)
}
 0x225   :  { %269 = dma.vmem_to_hbm [thread:$0]  %s267_s21, 16, %s638_s3, [#allocation5]  }
 0x226   :  { %534 = dma.done.wait [#allocation5], 16  }
 0x227   :  { %535 = vsyncadd [#allocation5], 4294967280 }
 0x228   :  { %273 = vsyncpa [#allocation4], 1 }
 0x229   :  { %274 = vsyncpa [#allocation7], 1 }
 0x22a   :  { %275 = vsyncpa [#allocation5], 1 }

</bundles_post_ra>
